<compile_context>
chip_gen: v7x
topology: tpu7x:2x2x1
jax: 0.10.0
libtpu: 0.0.40
codegen_flags: <defaults>
</compile_context>

<pallas_src>
import math

import jax
import jax.numpy as jnp
from jax import lax
from jax.experimental import pallas as pl
from jax.experimental.pallas import tpu as pltpu

_INV_SQRT2 = 1.0 / math.sqrt(2.0)
_MIB = 1024 * 1024
_INTERNAL_VMEM = 4 * _MIB  # allowance for Mosaic-internal scratch not modeled explicitly


def _round_up(x, m):
    return -(-x // m) * m


def _gelu_exact(x):
    # PyTorch nn.GELU() default: exact erf-based GELU.
    # x * (0.5 + 0.5*erf(x/sqrt2)) saves one VPU multiply vs 0.5*x*(1+erf(...)).
    return x * (0.5 + 0.5 * lax.erf(x * _INV_SQRT2))


# ----------------------------------------------------------------------------
# Kernel bodies
# ----------------------------------------------------------------------------
def _mlp_kernel_resident(x_ref, w1_ref, b1_ref, w2_ref, b2_ref, o_ref):
    # Weights resident in VMEM (constant block index) -> single fused body, no reduction axis.
    h = jnp.dot(x_ref[...], w1_ref[...], preferred_element_type=jnp.float32)
    h = _gelu_exact(h + b1_ref[...])
    y = jnp.dot(h.astype(w2_ref.dtype), w2_ref[...], preferred_element_type=jnp.float32)
    # Dropout with p=0.0 is the identity -> nothing to do.
    o_ref[...] = (y + b2_ref[...]).astype(o_ref.dtype)


def _mlp_kernel_chunked_accout(x_ref, w1_ref, b1_ref, w2_ref, b2_ref, o_ref):
    # f32 outputs: the output tile is resident across the hidden-chunk axis (index map
    # (i, 0)), so accumulate fc2 partial products directly in it — no scratch needed.
    k = pl.program_id(1)

    @pl.when(k == 0)
    def _():
        o_ref[...] = jnp.zeros_like(o_ref)

    h = jnp.dot(x_ref[...], w1_ref[...], preferred_element_type=jnp.float32)
    h = _gelu_exact(h + b1_ref[...])
    o_ref[...] += jnp.dot(h.astype(w2_ref.dtype), w2_ref[...],
                          preferred_element_type=jnp.float32)

    @pl.when(k == pl.num_programs(1) - 1)
    def _():
        # Dropout with p=0.0 is the identity.
        o_ref[...] += b2_ref[...]


def _mlp_kernel_chunked_scratch(x_ref, w1_ref, b1_ref, w2_ref, b2_ref, o_ref, acc_ref):
    # Non-f32 outputs: accumulate in an f32 VMEM scratch and cast/store on the last chunk.
    k = pl.program_id(1)

    @pl.when(k == 0)
    def _():
        acc_ref[...] = jnp.zeros_like(acc_ref)

    h = jnp.dot(x_ref[...], w1_ref[...], preferred_element_type=jnp.float32)
    h = _gelu_exact(h + b1_ref[...])
    acc_ref[...] += jnp.dot(h.astype(w2_ref.dtype), w2_ref[...],
                            preferred_element_type=jnp.float32)

    @pl.when(k == pl.num_programs(1) - 1)
    def _():
        o_ref[...] = (acc_ref[...] + b2_ref[...]).astype(o_ref.dtype)


# ----------------------------------------------------------------------------
# Wrapper
# ----------------------------------------------------------------------------
def _tpu_vmem_capacity_bytes():
    try:
        cap = getattr(pltpu.get_tpu_info(), "vmem_capacity_bytes", None)
        if cap:
            return int(cap)
    except Exception:
        pass
    return 64 * _MIB  # conservative fallback (v7x per-TC); v5e/v6e have 128 MiB


def mlp_pallas(x, w1, b1, w2, b2, *, tile_rows=None, hidden_chunk=2048, mxu_dtype=None):
    """x: [..., in_features]; w1: [in, hidden]; w2: [hidden, out]. Returns [..., out].

    mxu_dtype=jnp.bfloat16 is strongly recommended for throughput on v5e/v6e/v7x
    (matmul inputs in bf16; bias / GELU / accumulation stay f32). Default None keeps
    exact f32 parity with the PyTorch reference.
    """
    in_f = x.shape[-1]
    hidden = w1.shape[1]
    out_f = w2.shape[1]
    assert w1.shape == (in_f, hidden)
    assert b1.shape == (hidden,)
    assert w2.shape == (hidden, out_f)
    assert b2.shape == (out_f,)

    out_dtype = x.dtype
    lead_shape = x.shape[:-1]
    n = 1
    for d in lead_shape:
        n *= d
    x2 = x.reshape(n, in_f)

    # Lane-dense padding for feature dims. Narrow in_features are padded to 256 so the
    # fc1 contraction uses the full 256-deep systolic array on v6e/v7x (zeros are exact).
    in_p = 256 if in_f <= 128 else _round_up(in_f, 128)
    hid_p = _round_up(hidden, 128)
    out_p = _round_up(out_f, 128)

    compute_dtype = jnp.dtype(mxu_dtype) if mxu_dtype is not None else jnp.dtype(x.dtype)
    w_bytes = compute_dtype.itemsize
    act_bytes = w_bytes
    out_bytes = jnp.dtype(out_dtype).itemsize
    # Extra bytes/elt for the cast copy of the GELU output fed to the fc2 MXU.
    h_extra = 0 if compute_dtype.itemsize >= 4 else compute_dtype.itemsize
    out_is_f32 = jnp.dtype(out_dtype) == jnp.float32

    # Generation-aware VMEM budget: ~75% of physical (96 MiB on 128 MiB chips, 48 MiB on v7x).
    cap = _tpu_vmem_capacity_bytes()
    budget = cap * 3 // 4

    # Row tile: large by default so streamed weights (chunked path) are amortized.
    if tile_rows is None:
        tile_rows = 1024 if w_bytes <= 2 else 512
    tile_rows = _round_up(max(8, tile_rows), 8)
    tile_rows = min(tile_rows, _round_up(n, 8))
    # Megacore (v7x has 2 TensorCores sharding the "parallel" row axis): guarantee at
    # least 2 row tiles whenever the token count allows.
    if _round_up(n, tile_rows) // tile_rows < 2 and tile_rows >= 16:
        tile_rows = _round_up(max(8, tile_rows // 2), 8)

    def est_resident(tr):
        return (2 * tr * in_p * act_bytes                     # x tile (double buffered)
                + 2 * tr * out_p * out_bytes                  # out tile (double buffered)
                + 2 * (in_p * hid_p + hid_p * out_p) * w_bytes  # resident weights (2 bufs)
                + 2 * (hid_p + out_p) * 4                     # biases
                + tr * hid_p * (4 + h_extra)                  # f32 GELU h (+ cast copy)
                + tr * out_p * 4                              # f32 fc2 result pre-cast
                + _INTERNAL_VMEM)

    def est_chunked(tr, hc):
        scratch = 0 if out_is_f32 else tr * out_p * 4
        return (2 * tr * in_p * act_bytes
                + 2 * in_p * hc * w_bytes
                + 2 * hc * out_p * w_bytes
                + 2 * (hc + out_p) * 4
                + 2 * tr * out_p * out_bytes
                + scratch
                + tr * hc * (4 + h_extra)
                + tr * out_p * 4
                + _INTERNAL_VMEM)

    # --- path selection: weights-resident fast path if it fits the budget ---------
    res_tr = tile_rows
    while res_tr > 256 and est_resident(res_tr) > budget:
        res_tr = _round_up(max(8, res_tr // 2), 8)
    use_resident = est_resident(res_tr) <= budget

    if use_resident:
        tile_rows = res_tr
        hid_chunk = hid_p
        est = est_resident(tile_rows)
    else:
        # Chunked fallback: hidden dim is a reduction axis; shrink hidden_chunk first,
        # tile_rows only as a last resort (keeps FLOP/byte vs streamed weights high).
        max_hc = min(_round_up(max(128, hidden_chunk), 128), hid_p)
        cands = sorted(
            (c for c in range(128, hid_p + 1, 128) if hid_p % c == 0 and c <= max_hc),
            reverse=True,
        )

        def pick(tr):
            for c in cands:
                if est_chunked(tr, c) <= budget:
                    return c
            return None

        hid_chunk = pick(tile_rows)
        while hid_chunk is None and tile_rows > 8:
            tile_rows = _round_up(max(8, tile_rows // 2), 8)
            hid_chunk = pick(tile_rows)
        if hid_chunk is None:
            hid_chunk = 128  # last resort
        est = est_chunked(tile_rows, hid_chunk)

    n_pad = _round_up(n, tile_rows)

    # Pad (only when needed). Zero padding contributes exactly zero through both
    # matmuls and the GELU; padded rows/cols are sliced off after the kernel.
    if (n_pad, in_p) != (n, in_f):
        x2 = jnp.pad(x2, ((0, n_pad - n), (0, in_p - in_f)))
    w1p = jnp.pad(w1, ((0, in_p - in_f), (0, hid_p - hidden))) if (in_p, hid_p) != (in_f, hidden) else w1
    w2p = jnp.pad(w2, ((0, hid_p - hidden), (0, out_p - out_f))) if (hid_p, out_p) != (hidden, out_f) else w2
    b1p = (jnp.pad(b1, (0, hid_p - hidden)) if hid_p != hidden else b1).reshape(1, hid_p)
    b2p = (jnp.pad(b2, (0, out_p - out_f)) if out_p != out_f else b2).reshape(1, out_p)

    if mxu_dtype is not None:
        # bf16 (or other narrow) MXU inputs; biases / accumulation / GELU stay f32.
        x2 = x2.astype(mxu_dtype)
        w1p = w1p.astype(mxu_dtype)
        w2p = w2p.astype(mxu_dtype)
    b1p = b1p.astype(jnp.float32)
    b2p = b2p.astype(jnp.float32)

    # Scoped VMEM limit: use the generation budget (never the full physical VMEM).
    vmem_limit = int(min(max(budget, est), cap - 8 * _MIB))

    if use_resident:
        grid = (n_pad // tile_rows,)
        in_specs = [
            pl.BlockSpec((tile_rows, in_p), lambda i: (i, 0)),
            pl.BlockSpec((in_p, hid_p), lambda i: (0, 0)),   # resident: DMA'd once
            pl.BlockSpec((1, hid_p), lambda i: (0, 0)),
            pl.BlockSpec((hid_p, out_p), lambda i: (0, 0)),  # resident: DMA'd once
            pl.BlockSpec((1, out_p), lambda i: (0, 0)),
        ]
        out_specs = pl.BlockSpec((tile_rows, out_p), lambda i: (i, 0))
        kernel = _mlp_kernel_resident
        scratch_shapes = []
        dim_semantics = ("parallel",)
    else:
        grid = (n_pad // tile_rows, hid_p // hid_chunk)
        in_specs = [
            pl.BlockSpec((tile_rows, in_p), lambda i, k: (i, 0)),
            pl.BlockSpec((in_p, hid_chunk), lambda i, k: (0, k)),
            pl.BlockSpec((1, hid_chunk), lambda i, k: (0, k)),
            pl.BlockSpec((hid_chunk, out_p), lambda i, k: (k, 0)),
            pl.BlockSpec((1, out_p), lambda i, k: (0, 0)),
        ]
        out_specs = pl.BlockSpec((tile_rows, out_p), lambda i, k: (i, 0))
        if out_is_f32:
            kernel = _mlp_kernel_chunked_accout
            scratch_shapes = []
        else:
            kernel = _mlp_kernel_chunked_scratch
            scratch_shapes = [pltpu.VMEM((tile_rows, out_p), jnp.float32)]
        dim_semantics = ("parallel", "arbitrary")

    out = pl.pallas_call(
        kernel,
        out_shape=jax.ShapeDtypeStruct((n_pad, out_p), out_dtype),
        grid_spec=pltpu.PrefetchScalarGridSpec(
            num_scalar_prefetch=0,
            grid=grid,
            in_specs=in_specs,
            out_specs=out_specs,
            scratch_shapes=scratch_shapes,
        ),
        compiler_params=pltpu.CompilerParams(
            dimension_semantics=dim_semantics,
            vmem_limit_bytes=vmem_limit,
        ),
    )(x2, w1p, b1p, w2p, b2p)

    out = out[:n, :out_f]
    return out.reshape(*lead_shape, out_f)


def init_mlp_params(key, in_features, hidden_features, out_features, dtype=jnp.float32):
    """Deterministic init mimicking nn.Linear's kaiming-uniform-ish scheme."""
    k1, k2, k3, k4 = jax.random.split(key, 4)
    bound1 = 1.0 / math.sqrt(in_features)
    bound2 = 1.0 / math.sqrt(hidden_features)
    # Stored as [in, out] (transpose of PyTorch's [out, in]) for direct x @ w.
    w1 = jax.random.uniform(k1, (in_features, hidden_features), dtype, -bound1, bound1)
    b1 = jax.random.uniform(k2, (hidden_features,), dtype, -bound1, bound1)
    w2 = jax.random.uniform(k3, (hidden_features, out_features), dtype, -bound2, bound2)
    b2 = jax.random.uniform(k4, (out_features,), dtype, -bound2, bound2)
    return w1, b1, w2, b2


if __name__ == "__main__":
    key = jax.random.PRNGKey(0)
    kx, kp = jax.random.split(key)

    batch, seq = 2, 8
    in_features, hidden_features, out_features = 32, 64, 32

    x = jax.random.normal(kx, (batch, seq, in_features), dtype=jnp.float32)
    w1, b1, w2, b2 = init_mlp_params(kp, in_features, hidden_features, out_features)

    # f32 path (exact parity with PyTorch nn.GELU() default, dropout p=0.0 identity).
    y = jax.block_until_ready(mlp_pallas(x, w1, b1, w2, b2))

    h_ref = x @ w1 + b1
    h_ref = 0.5 * h_ref * (1.0 + lax.erf(h_ref / math.sqrt(2.0)))
    y_ref = h_ref @ w2 + b2
    assert y.shape == (batch, seq, out_features)
    assert jnp.allclose(y, y_ref, atol=1e-5, rtol=1e-5)

    # bf16 MXU-input fast path (recommended for production): loose check vs f32 reference.
    y_bf16 = jax.block_until_ready(mlp_pallas(x, w1, b1, w2, b2, mxu_dtype=jnp.bfloat16))
    assert y_bf16.shape == (batch, seq, out_features)
    assert bool(jnp.all(jnp.isfinite(y_bf16)))
    assert float(jnp.max(jnp.abs(y_bf16 - y_ref))) < 0.25

    print("KERNEL_OK")
</pallas_src>

<mosaic_0001>
module attributes {stable_mosaic.version = 11 : i64} {
  func.func @_mlp_kernel_resident(%arg0: i32, %arg1: memref<8x256xf32, #tpu.memory_space<vmem>>, %arg2: memref<256x128xf32, #tpu.memory_space<vmem>>, %arg3: memref<1x128xf32, #tpu.memory_space<vmem>>, %arg4: memref<128x128xf32, #tpu.memory_space<vmem>>, %arg5: memref<1x128xf32, #tpu.memory_space<vmem>>, %arg6: memref<8x128xf32, #tpu.memory_space<vmem>>) attributes {dimension_semantics = [#tpu.dimension_semantics<parallel>], iteration_bounds = array<i64: 2>, scalar_prefetch = 0 : i64, scratch_operands = 0 : i64, tpu.core_type = #tpu.core_type<tc>, window_params = [{transform_indices = @transform_0, window_bounds = array<i64: 8, 256>}, {pipeline_mode = #tpu.pipeline_mode<synchronous>, transform_indices = @transform_1, window_bounds = array<i64: 256, 128>}, {pipeline_mode = #tpu.pipeline_mode<synchronous>, transform_indices = @transform_2, window_bounds = array<i64: 1, 128>}, {pipeline_mode = #tpu.pipeline_mode<synchronous>, transform_indices = @transform_3, window_bounds = array<i64: 128, 128>}, {pipeline_mode = #tpu.pipeline_mode<synchronous>, transform_indices = @transform_4, window_bounds = array<i64: 1, 128>}, {transform_indices = @transform_5, window_bounds = array<i64: 8, 128>}]} {
    %c0 = arith.constant 0 : index
    %c0_0 = arith.constant 0 : index
    %0 = vector.load %arg1[%c0, %c0_0] : memref<8x256xf32, #tpu.memory_space<vmem>>, vector<8x256xf32>
    %c0_1 = arith.constant 0 : index
    %c0_2 = arith.constant 0 : index
    %1 = vector.load %arg2[%c0_1, %c0_2] : memref<256x128xf32, #tpu.memory_space<vmem>>, vector<256x128xf32>
    %cst = arith.constant dense<0.000000e+00> : vector<8x128xf32>
    %2 = tpu.matmul %0, %1, %cst {dimension_numbers = #tpu.dot_dimension_numbers<[1], [0], [0], [1], [0, 0, 1, 1], [], []>} : vector<8x256xf32>, vector<256x128xf32>, vector<8x128xf32> -> vector<8x128xf32>
    %c0_3 = arith.constant 0 : index
    %c0_4 = arith.constant 0 : index
    %3 = vector.load %arg3[%c0_3, %c0_4] : memref<1x128xf32, #tpu.memory_space<vmem>>, vector<1x128xf32>
    %4 = vector.broadcast %3 : vector<1x128xf32> to vector<8x128xf32>
    %5 = arith.addf %2, %4 : vector<8x128xf32>
    %cst_5 = arith.constant 0.707106769 : f32
    %6 = vector.broadcast %cst_5 : f32 to vector<8x128xf32>
    %7 = arith.mulf %5, %6 : vector<8x128xf32>
    %8 = math.erf %7 : vector<8x128xf32>
    %cst_6 = arith.constant 5.000000e-01 : f32
    %9 = vector.broadcast %cst_6 : f32 to vector<8x128xf32>
    %10 = arith.mulf %9, %8 : vector<8x128xf32>
    %cst_7 = arith.constant 5.000000e-01 : f32
    %11 = vector.broadcast %cst_7 : f32 to vector<8x128xf32>
    %12 = arith.addf %11, %10 : vector<8x128xf32>
    %13 = arith.mulf %5, %12 : vector<8x128xf32>
    %c0_8 = arith.constant 0 : index
    %c0_9 = arith.constant 0 : index
    %14 = vector.load %arg4[%c0_8, %c0_9] : memref<128x128xf32, #tpu.memory_space<vmem>>, vector<128x128xf32>
    %cst_10 = arith.constant dense<0.000000e+00> : vector<8x128xf32>
    %15 = tpu.matmul %13, %14, %cst_10 {dimension_numbers = #tpu.dot_dimension_numbers<[1], [0], [0], [1], [0, 0, 1, 1], [], []>} : vector<8x128xf32>, vector<128x128xf32>, vector<8x128xf32> -> vector<8x128xf32>
    %c0_11 = arith.constant 0 : index
    %c0_12 = arith.constant 0 : index
    %16 = vector.load %arg5[%c0_11, %c0_12] : memref<1x128xf32, #tpu.memory_space<vmem>>, vector<1x128xf32>
    %17 = vector.broadcast %16 : vector<1x128xf32> to vector<8x128xf32>
    %18 = arith.addf %15, %17 : vector<8x128xf32>
    %c0_13 = arith.constant 0 : index
    %c0_14 = arith.constant 0 : index
    %19 = vector.load %arg6[%c0_13, %c0_14] : memref<8x128xf32, #tpu.memory_space<vmem>>, vector<8x128xf32>
    tpu.vector_store %arg6[%c0_13, %c0_14], %18 {strides = array<i32>} : memref<8x128xf32, #tpu.memory_space<vmem>>, vector<8x128xf32>,
    return
  }
  func.func @transform_0(%arg0: i32) -> (i32, i32) {
    %c0_i32 = arith.constant 0 : i32
    %c0_i32_0 = arith.constant 0 : i32
    return %arg0, %c0_i32 : i32, i32
  }
  func.func @transform_1(%arg0: i32) -> (i32, i32) {
    %c0_i32 = arith.constant 0 : i32
    %c0_i32_0 = arith.constant 0 : i32
    %c0_i32_1 = arith.constant 0 : i32
    return %c0_i32, %c0_i32_0 : i32, i32
  }
  func.func @transform_2(%arg0: i32) -> (i32, i32) {
    %c0_i32 = arith.constant 0 : i32
    %c0_i32_0 = arith.constant 0 : i32
    %c0_i32_1 = arith.constant 0 : i32
    return %c0_i32, %c0_i32_0 : i32, i32
  }
  func.func @transform_3(%arg0: i32) -> (i32, i32) {
    %c0_i32 = arith.constant 0 : i32
    %c0_i32_0 = arith.constant 0 : i32
    %c0_i32_1 = arith.constant 0 : i32
    return %c0_i32, %c0_i32_0 : i32, i32
  }
  func.func @transform_4(%arg0: i32) -> (i32, i32) {
    %c0_i32 = arith.constant 0 : i32
    %c0_i32_0 = arith.constant 0 : i32
    %c0_i32_1 = arith.constant 0 : i32
    return %c0_i32, %c0_i32_0 : i32, i32
  }
  func.func @transform_5(%arg0: i32) -> (i32, i32) {
    %c0_i32 = arith.constant 0 : i32
    %c0_i32_0 = arith.constant 0 : i32
    return %arg0, %c0_i32 : i32, i32
  }
}

</mosaic_0001>

<bundles_post_ra>
// kernel: tpu_custom_call.1
= control target key start
LH: loop header
LB: loop body
LE: loop exit
PB: predicated region body
PF: predicated region fallthrough
CT: control target
= control target key end

     0   :  { %10 = vsyncpa [#allocation3], 0  ;;  %s1265_s0 = inlined_call_operand.hbm [shape: f32[16,256], index: 0, kind: input, shape index: {}]   ;;  %s1266_s1 = inlined_call_operand.hbm [shape: f32[256,128], index: 1, kind: input, shape index: {}]   ;;  %s1267_s2 = inlined_call_operand.vmem [shape: f32[1,128], index: 2, kind: input, shape index: {}]   ;;  %s1268_s3 = inlined_call_operand.hbm [shape: f32[128,128], index: 3, kind: input, shape index: {}]   ;;  %s1269_s4 = inlined_call_operand.vmem [shape: f32[1,128], index: 4, kind: input, shape index: {}]   ;;  %s1270_s5 = inlined_call_operand.hbm [shape: f32[16,128], index: 5, kind: output, shape index: {}]  }
   0x1   :  { %12 = vsyncpa [#allocation3 + $0x1], 0 }
   0x2   :  { %13 = vsyncpa [#allocation6], 0 }
   0x3   :  { %14 = vsyncpa [#allocation4], 0 }
   0x4   :  { %16 = vsyncpa [#allocation4 + $0x1], 0  ;;  %s1017_s18 = smov 0   ;;  %s1019_s19 = smov 0  }
   0x5   :  { %s1021_s20 = smov 0   ;;  %s1023_s21 = smov 0  }
   0x6 LB: > { %s1038_s22 = sadd.s32 4294967295, %s976_s21   ;;  %s583_s23 = sadd.s32 4294967294, %s976_s21   ;;  %s976_s21 = sphi %s1023_s21, %s1290_s21   ;;  %s972_s20 = sphi %s1021_s20, %s1289_s20   ;;  %s968_s19 = sphi %s1019_s19, %s1288_s19   ;;  %s964_s18 = sphi %s1017_s18, %s1287_s18  }
   0x7   : > { %p42_p0 = scmp.ne.s32.totalorder %s968_s19, %s964_s18  ;;  %p1271_p1 = scmp.eq.s32.totalorder %s1038_s22, 0 }
   0x8   : > { %p156_p3 = scmp.eq.s32.totalorder %s583_s23, 1  ;;  %p584_p5 = scmp.ge.s32.totalorder %s976_s21, 1 }
   0x9   : > { %p1047_p4 = por %p1271_p1, %p42_p0  ;;  %p163_p7 = scmp.lt.s32.totalorder %s976_s21, 3 }
   0xa   : > { %p1052_p6 = por %p156_p3, %p42_p0  ;;  %s978_s27 = smov [#allocation5]  }
   0xb   : > { %s1274_s24 = scalar_select %p1047_p4, 1, 0 }
   0xc   : > { %s1275_s25 = scalar_select %p1052_p6, 1, 0 }
   0xd   : > { %p1057_p8 = pnand %p584_p5, %p163_p7  ;;  %s175_s28 = sshll.u32 %s978_s27, 4  ;;  %s1061_s28 = int_to_ptr.vmem [resolvable:$true] %s175_s28 }
   0xe   : > { %s979_s30 = smov [#allocation7]   ;;  %s820_s9 = scalar_lea.hbm %s1266_s1, 4096 }
   0xf   : > { %p758_p9 = pneg %p1057_p8  ;;  %s191_s6 = sshll.u32 %s979_s30, 4  ;;  %s1072_s6 = int_to_ptr.vmem [resolvable:$true] %s191_s6 }
  0x10   : > { %p821_p12 = scmp.ne.s32.totalorder %s1266_s1, %s820_s9  ;;  %p827_p5 = scmp.lt.u32.totalorder %s820_s9, %s1266_s1 }
  0x11   : > { %p1068_p11 = pnand %p758_p9, %p1271_p1 }
  0x13   : > { %p822_p13 = pneg %p1068_p11 }
  0x15   : > { %p823_p0 = pnand %p822_p13, %p821_p12 }
  0x17   : > { %p824_p3 = pneg %p823_p0 }
  0x19   : > { %p829_p7 = pnand %p827_p5, %p824_p3 }
  0x1b   : > { %832 = shalt.err (!%p829_p7)
}
  0x1c   : > { %s833_s14 = scalar_lea.vmem %s1061_s28, 4096  ;;  %p841_p2 = scmp.lt.s32.totalorder %s1061_s28, %s1061_s28 }
  0x1d   : > { %p834_p9 = scmp.ne.s32.totalorder %s1061_s28, %s833_s14  ;;  %p842_p12 = scmp.lt.s32.totalorder %s833_s14, %s833_s14 }
  0x1f   : > { %p836_p10 = pnand %p834_p9, %p822_p13  ;;  %p843_p0 = por %p842_p12, %p841_p2 }
  0x21   : > { %p837_p1 = pneg %p836_p10 }
  0x23   : > { %p844_p6 = pnand %p843_p0, %p837_p1 }
  0x25   : > { %847 = shalt.err (!%p844_p6)
}
  0x26   : > { %s980_s15 = smov 128   ;;  %s981_s16 = smov 8  }
  0x27   : > { %761 = dma.hbm_to_vmem [thread:$0]  (!%p1068_p11), %s1266_s1, 4096, %s1061_s28, [#allocation6], %s980_s15, %s980_s15, %s981_s16  }
  0x28   : > { %s848_s7 = scalar_lea.hbm %s1268_s3, 2048 }
  0x29   : > { %p849_p2 = scmp.ne.s32.totalorder %s1268_s3, %s848_s7  ;;  %p855_p10 = scmp.lt.u32.totalorder %s848_s7, %s1268_s3 }
  0x2b   : > { %p851_p1 = pnand %p849_p2, %p822_p13 }
  0x2d   : > { %p852_p6 = pneg %p851_p1 }
  0x2f   : > { %p857_p3 = pnand %p855_p10, %p852_p6 }
  0x31   : > { %860 = shalt.err (!%p857_p3)
}
  0x32   : > { %s861_s28 = scalar_lea.vmem %s1072_s6, 2048  ;;  %p869_p12 = scmp.lt.s32.totalorder %s1072_s6, %s1072_s6 }
  0x33   : > { %p862_p5 = scmp.ne.s32.totalorder %s1072_s6, %s861_s28  ;;  %p870_p0 = scmp.lt.s32.totalorder %s861_s28, %s861_s28 }
  0x35   : > { %p864_p7 = pnand %p862_p5, %p822_p13  ;;  %p871_p2 = por %p870_p0, %p869_p12 }
  0x37   : > { %p865_p9 = pneg %p864_p7 }
  0x39   : > { %p872_p1 = pnand %p871_p2, %p865_p9 }
  0x3b   : > { %875 = shalt.err (!%p872_p1)
}
  0x3c   : > { %764 = dma.hbm_to_vmem [thread:$0]  (!%p1068_p11), %s1268_s3, 2048, %s1072_s6, [#allocation6], %s980_s15, %s980_s15, %s981_s16  }
  0x3d   : > { %s1127_s14 = sadd.s32 1, %s976_s21   ;;  %s29_s29 = sadd.s32 1, %s972_s20 }
  0x3e   : > { %s26_s17 = ssub.s32 %s976_s21, %s1127_s14  ;;  %p36_p13 = scmp.ne.s32.totalorder %s972_s20, %s968_s19 }
  0x3f   : > { %p27_p6 = scmp.eq.s32.totalorder %s26_s17, 0  ;;  %p37_p10 = scmp.eq.s32.totalorder %s976_s21, 0 }
  0x40   : > { %p1278_p3 = scmp.eq.s32.totalorder %s1038_s22, 1  ;;  %p775_p7 = scmp.lt.s32.totalorder %s976_s21, 2 }
  0x41   : > { %s1143_s27 = scalar_select %p27_p6, %s972_s20, %s29_s29  }
  0x42   : > { %p1137_p5 = por %p1278_p3, %p36_p13  ;;  %p38_p9 = por %p37_p10, %p36_p13 }
  0x43   : > { %s208_s30 = sand.u32 1, %s972_s20   ;;  %s602_s6 = sshll.u32 %s976_s21, 8 }
  0x44   : > { %s1279_s23 = scalar_select %p1137_p5, 1, 0 }
  0x45   : > { %s588_s7 = sshll.u32 %s208_s30, 4  ;;  %s1150_s8 = scalar_lea.hbm %s1265_s0, %s602_s6 }
  0x46   : > { %s212_s9 = scalar_lea.vmem [#allocation2], %s588_s7  ;;  %p1154_p11 = pnand %p775_p7, %p38_p9 }
  0x47   : > { %s220_s10 = sshll.u32 %s212_s9, 4  ;;  %s209_s28 = scalar_lea.sflag [#allocation3], %s208_s30  ;;  %s1152_s10 = int_to_ptr.vmem [resolvable:$true] %s220_s10 }
  0x48   : > { %s876_s12 = scalar_lea.hbm %s1150_s8, 256  ;;  %p878_p0 = pneg %p1154_p11 }
  0x49   : > { %p877_p12 = scmp.ne.s32.totalorder %s1150_s8, %s876_s12  ;;  %s881_s17 = scalar_lea.hbm %s1265_s0, 512 }
  0x4a   : > { %p882_p13 = scmp.lt.u32.totalorder %s1150_s8, %s1265_s0  ;;  %p883_p6 = scmp.lt.u32.totalorder %s881_s17, %s876_s12 }
  0x4b   : > { %p879_p2 = pnand %p878_p0, %p877_p12  ;;  %p885_p3 = scmp.lt.u32.totalorder %s876_s12, %s1150_s8 }
  0x4c   : > { %p884_p10 = por %p883_p6, %p882_p13 }
  0x4d   : > { %p880_p1 = pneg %p879_p2 }
  0x4e   : > { %p886_p7 = por %p885_p3, %p884_p10 }
  0x50   : > { %p887_p9 = pnand %p886_p7, %p880_p1 }
  0x52   : > { %890 = shalt.err (!%p887_p9)
}
  0x53   : > { %s891_s30 = scalar_lea.vmem %s1152_s10, 256  ;;  %s982_s15 = smov [#allocation2]  }
  0x54   : > { %p892_p12 = scmp.ne.s32.totalorder %s1152_s10, %s891_s30  ;;  %s896_s16 = sshll.u32 %s982_s15, 4  ;;  %s897_s16 = int_to_ptr.vmem [resolvable:$false] %s896_s16 }
  0x55   : > { %s898_s9 = scalar_lea.vmem %s897_s16, 512  ;;  %p899_p4 = scmp.lt.s32.totalorder %s1152_s10, %s897_s16 }
  0x56   : > { %p894_p2 = pnand %p892_p12, %p878_p0  ;;  %p900_p13 = scmp.lt.s32.totalorder %s898_s9, %s891_s30 }
  0x58   : > { %p895_p5 = pneg %p894_p2  ;;  %p901_p6 = por %p900_p13, %p899_p4 }
  0x5a   : > { %p902_p10 = pnand %p901_p6, %p895_p5 }
  0x5c   : > { %905 = shalt.err (!%p902_p10)
}
  0x5d   : > { %768 = dma.hbm_to_vmem [thread:$0]  (!%p1154_p11), %s1150_s8, 256, %s1152_s10, %s209_s28  }
  0x5e   : > { %229 = sbr.rel (%p1057_p8) target bundleno = 604 (0x25c), region = 40  ;;  %s1186_s12 = sand.u32 (!%p1057_p8), 1, %s968_s19  }
  0x5f   : > { %s592_s13 = sshll.u32 (!%p1057_p8), %s1186_s12, 4  ;;  %s232_s29 = scalar_lea.sflag (!%p1057_p8), [#allocation3], %s1186_s12 }
  0x60   : > { %s1190_s17 = scalar_lea.vmem (!%p1057_p8), [#allocation2], %s592_s13  ;;  %p1281_p4 = scmp.ne.s32.totalorder (!%p1057_p8), %s1274_s24, 0 }
  0x65   : > { %951 = dma.done.wait (%p1281_p4), %s232_s29, 256  }
  0x66   : > { %953 = vsyncadd (%p1281_p4), %s232_s29, 4294967040  ;;  %p1282_p5 = scmp.eq.s32.totalorder %s1038_s22, 0 }
  0x68   : > { %955 = dma.done.wait (%p1282_p5), [#allocation6], 6144   ;;  %p1283_p8 = pmov %p1282_p5 }
  0x69   : > { %v983_v0 = vmov 0.0|0.0   ;;  %v288_v1 = vld [vmem:[#allocation5 + $0x80] sm:$0xff]  ;;  %v289_v2 = vld [vmem:[#allocation5 + $0x88] sm:$0xff]  ;;  %v290_v6 = vld [vmem:[#allocation5 + $0x90] sm:$0xff]  ;;  %vm984_vm0 = vmmov 0   ;;  %s595_s8 = sshll.u32 %s1186_s12, 3 }
  0x6a   : > { %957 = vsyncadd (%p1283_p8), [#allocation6], 4294961152  ;;  %722 = vmatprep.subr.bf16.mxu1 %v983_v0  ;;  %v272_v3 = vld [vmem:[#allocation5] sm:$0xff]  ;;  %v690_v4 = vpack.c.bf16 %v289_v2, %v288_v1  ;;  %v273_v5 = vld [vmem:[#allocation5 + $0x8] sm:$0xff]  ;;  %s599_s28 = sshll.u32 %s1038_s22, 7  ;;  %s269_s7 = scalar_lea.vmem [#allocation8], %s595_s8 }
  0x6b   : > { %v291_v7 = vld [vmem:[#allocation5 + $0x98] sm:$0xff]  ;;  %v692_v8 = vpack.c.bf16 %v273_v5, %v272_v3  ;;  %v274_v10 = vld [vmem:[#allocation5 + $0x10] sm:$0xff]  ;;  %v292_v12 = vld [vmem:[#allocation5 + $0xa0] sm:$0xff]  ;;  %v985_v5 = vmov 0.0   ;;  %s494_s6 = sshll.u32 %s269_s7, 4  ;;  %s1221_s16 = scalar_lea.hbm %s1270_s5, %s599_s28  ;;  %s1223_s6 = int_to_ptr.vmem [resolvable:$true] %s494_s6 }
  0x6c   : > { %v694_v9 = vpack.c.bf16 %v291_v7, %v290_v6  ;;  %v275_v11 = vld [vmem:[#allocation5 + $0x18] sm:$0xff]  ;;  %691 = vmatprep.subr.bf16.mxu0 %v690_v4  ;;  %v293_v13 = vld [vmem:[#allocation5 + $0xa8] sm:$0xff]  ;;  %v276_v16 = vld [vmem:[#allocation5 + $0x20] sm:$0xff]  ;;  %687 = vmatprep.mubr.msk.f32.mxu1 %vm984_vm0, %v985_v5  ;;  %s481_s9 = scalar_lea.sflag [#allocation4], %s1186_s12  ;;  %s906_s13 = scalar_lea.vmem %s1223_s6, 128 }
  0x6d   : > { %693 = vmatpush3.bf16.msra.mxu0 %v692_v8  ;;  %v696_v14 = vpack.c.bf16 %v275_v11, %v274_v10  ;;  %v698_v15 = vpack.c.bf16 %v293_v13, %v292_v12  ;;  %v277_v17 = vld [vmem:[#allocation5 + $0x28] sm:$0xff]  ;;  %v294_v18 = vld [vmem:[#allocation5 + $0xb0] sm:$0xff]  ;;  %v295_v19 = vld [vmem:[#allocation5 + $0xb8] sm:$0xff]  ;;  %p907_p11 = scmp.ne.s32.totalorder %s1223_s6, %s906_s13  ;;  %p1284_p0 = scmp.ne.s32.totalorder %s1279_s23, 0 }
  0x6e   : > { %695 = vmatprep.subr.bf16.mxu0 %v694_v9  ;;  %v700_v20 = vpack.c.bf16 %v277_v17, %v276_v16  ;;  %v702_v21 = vpack.c.bf16 %v295_v19, %v294_v18  ;;  %v278_v22 = vld [vmem:[#allocation5 + $0x30] sm:$0xff]  ;;  %v279_v23 = vld [vmem:[#allocation5 + $0x38] sm:$0xff]  ;;  %v296_v24 = vld [vmem:[#allocation5 + $0xc0] sm:$0xff]  ;;  %s986_s22 = smov [#allocation8]  }
  0x6f   : > { %v297_v25 = vld [vmem:[#allocation5 + $0xc8] sm:$0xff]  ;;  %v386_v27 = vld [vmem:[#allocation7] sm:$0xff]  ;;  %v704_v29 = vpack.c.bf16 %v279_v23, %v278_v22  ;;  %v388_v31 = vld [vmem:[#allocation7 + $0x10] sm:$0xff]  ;;  %p908_p1 = pnand %p907_p11, %p1284_p0  ;;  %s910_s29 = sshll.u32 %s986_s22, 4  ;;  %s911_s29 = int_to_ptr.vmem [resolvable:$false] %s910_s29 }
  0x70   : > { %v271_v26 = vld [vmem:[%s1190_s17 + $0x8] sm:$0xff]  ;;  %v706_v33 = vpack.c.bf16 %v297_v25, %v296_v24  ;;  %v280_v34 = vld [vmem:[#allocation5 + $0x40] sm:$0xff]  ;;  %v298_v36 = vld [vmem:[#allocation5 + $0xd0] sm:$0xff]  ;;  %p913_p7 = scmp.lt.s32.totalorder %s1223_s6, %s911_s29 }
  0x71   : > { %697 = vmatpush3.bf16.msra.mxu0 %v696_v14  ;;  %375 = vmatprep.mubr.f32.mxu0 %v271_v26  ;;  %v387_v28 = vld [vmem:[#allocation7 + $0x8] sm:$0xff]  ;;  %v389_v32 = vld [vmem:[#allocation7 + $0x18] sm:$0xff]  ;;  %v282_v41 = vld [vmem:[#allocation5 + $0x50] sm:$0xff]  ;;  %p909_p3 = pneg %p908_p1 }
  0x72   : > { %699 = vmatprep.subr.bf16.mxu0 %v698_v15  ;;  %v723_v30 = vpack.c.bf16 %v387_v28, %v386_v27  ;;  %v281_v35 = vld [vmem:[#allocation5 + $0x48] sm:$0xff]  ;;  %v299_v37 = vld [vmem:[#allocation5 + $0xd8] sm:$0xff]  ;;  %v726_v38 = vpack.c.bf16 %v389_v32, %v388_v31  ;;  %v300_v43 = vld [vmem:[#allocation5 + $0xe0] sm:$0xff] }
  0x73   : > { %v708_v39 = vpack.c.bf16 %v281_v35, %v280_v34  ;;  %v710_v40 = vpack.c.bf16 %v299_v37, %v298_v36  ;;  %v283_v42 = vld [vmem:[#allocation5 + $0x58] sm:$0xff]  ;;  %v301_v44 = vld [vmem:[#allocation5 + $0xe8] sm:$0xff]  ;;  %v284_v47 = vld [vmem:[#allocation5 + $0x60] sm:$0xff] }
  0x74   : > { %724 = vmatpush3.bf16.msra.mxu1 %v723_v30  ;;  %v712_v45 = vpack.c.bf16 %v283_v42, %v282_v41  ;;  %v714_v46 = vpack.c.bf16 %v301_v44, %v300_v43  ;;  %v285_v48 = vld [vmem:[#allocation5 + $0x68] sm:$0xff]  ;;  %v302_v49 = vld [vmem:[#allocation5 + $0xf0] sm:$0xff]  ;;  %v303_v50 = vld [vmem:[#allocation5 + $0xf8] sm:$0xff] }
  0x75   : > { %701 = vmatpush3.bf16.msra.mxu0 %v700_v20  ;;  %725 = vmatprep.subr.bf16.mxu1 %v983_v0  ;;  %v716_v51 = vpack.c.bf16 %v285_v48, %v284_v47  ;;  %v718_v52 = vpack.c.bf16 %v303_v50, %v302_v49  ;;  %v286_v53 = vld [vmem:[#allocation5 + $0x70] sm:$0xff]  ;;  %v287_v54 = vld [vmem:[#allocation5 + $0x78] sm:$0xff]  ;;  %v390_v57 = vld [vmem:[#allocation7 + $0x20] sm:$0xff] }
  0x76   : > { %703 = vmatprep.subr.bf16.mxu0 %v702_v21  ;;  %v720_v55 = vpack.c.bf16 %v287_v54, %v286_v53  ;;  %v270_v56 = vld [vmem:[%s1190_s17] sm:$0xff]  ;;  %v391_v58 = vld [vmem:[#allocation7 + $0x28] sm:$0xff]  ;;  %v393_v61 = vld [vmem:[#allocation7 + $0x38] sm:$0xff]  ;;  %s912_s17 = scalar_lea.vmem %s911_s29, 256 }
  0x77   : > { %v729_v59 = vpack.c.bf16 %v391_v58, %v390_v57  ;;  %v392_v60 = vld [vmem:[#allocation7 + $0x30] sm:$0xff]  ;;  %v394_v63 = vld [vmem:[#allocation7 + $0x40] sm:$0xff]  ;;  %v395_v1 = vld [vmem:[#allocation7 + $0x48] sm:$0xff]  ;;  %p914_p9 = scmp.lt.s32.totalorder %s912_s17, %s906_s13 }
  0x78   : > { %727 = vmatpush3.bf16.msra.mxu1 %v726_v38  ;;  %v732_v62 = vpack.c.bf16 %v393_v61, %v392_v60  ;;  %v735_v2 = vpack.c.bf16 %v395_v1, %v394_v63  ;;  %v396_v3 = vld [vmem:[#allocation7 + $0x50] sm:$0xff]  ;;  %v397_v4 = vld [vmem:[#allocation7 + $0x58] sm:$0xff]  ;;  %v398_v7 = vld [vmem:[#allocation7 + $0x60] sm:$0xff] }
  0x79   : > { %705 = vmatpush3.bf16.msra.mxu0 %v704_v29  ;;  %728 = vmatprep.subr.bf16.mxu1 %v983_v0  ;;  %v738_v6 = vpack.c.bf16 %v397_v4, %v396_v3  ;;  %v399_v8 = vld [vmem:[#allocation7 + $0x68] sm:$0xff]  ;;  %v400_v10 = vld [vmem:[#allocation7 + $0x70] sm:$0xff]  ;;  %v401_v11 = vld [vmem:[#allocation7 + $0x78] sm:$0xff]  ;;  %p915_p12 = por %p914_p9, %p913_p7 }
  0x7a   : > { %707 = vmatprep.subr.bf16.mxu0 %v706_v33  ;;  %v741_v9 = vpack.c.bf16 %v399_v8, %v398_v7  ;;  %v744_v12 = vpack.c.bf16 %v401_v11, %v400_v10  ;;  %v596_v14 = vld [vmem:[%s1267_s2] ss:$0 sm:$0xff] }
  0x7b   : > { %p916_p2 = pnand %p915_p12, %p909_p3 }
  0x7c   : > { %730 = vmatpush3.bf16.msra.mxu1 %v729_v59 }
  0x7d   : > { %709 = vmatpush3.bf16.msra.mxu0 %v708_v39  ;;  %731 = vmatprep.subr.bf16.mxu1 %v983_v0 }
  0x7e   : > { %711 = vmatprep.subr.bf16.mxu0 %v710_v40 }
  0x80   : > { %733 = vmatpush3.bf16.msra.mxu1 %v732_v62 }
  0x81   : > { %713 = vmatpush3.bf16.msra.mxu0 %v712_v45  ;;  %734 = vmatprep.subr.bf16.mxu1 %v983_v0 }
  0x82   : > { %715 = vmatprep.subr.bf16.mxu0 %v714_v46 }
  0x84   : > { %736 = vmatpush3.bf16.msra.mxu1 %v735_v2 }
  0x85   : > { %717 = vmatpush3.bf16.msra.mxu0 %v716_v51  ;;  %737 = vmatprep.subr.bf16.mxu1 %v983_v0 }
  0x86   : > { %719 = vmatprep.subr.bf16.mxu0 %v718_v52 }
  0x88   : > { %739 = vmatpush3.bf16.msra.mxu1 %v738_v6 }
  0x89   : > { %721 = vmatpush3.bf16.msra.mxu0 %v720_v55  ;;  %740 = vmatprep.subr.bf16.mxu1 %v983_v0 }
  0x8c   : > { %376 = vmatmul.mubr.f32.vlgmr.msra.gmra.mrb[0].mxu0 %v270_v56  ;;  %742 = vmatpush3.bf16.msra.mxu1 %v741_v9 }
  0x8d   : > { %743 = vmatprep.subr.bf16.mxu1 %v983_v0  ;;  %v597_v0 = vld [vmem:[%s1269_s4] ss:$0 sm:$0xff] }
  0x90   : > { %745 = vmatpush3.bf16.msra.mxu1 %v744_v12 }
 0x15f   : > { %v635_v13 = vpop.f32.mrb[0].mxu0 }
 0x160   : > { %v636_v15 = vpop.f32.mrb[1].mxu0 }
 0x161   : > { %v637_v16 = vadd.f32 %v636_v15, %v635_v13 }
 0x163   : > { %v378_v17 = vadd.f32 %v637_v16, %v596_v14 }
 0x165   : > { %v381_v18 = vmul.f32 0.70710677, %v378_v17 }
 0x167   : > { %818 = verf.f32 %v381_v18 }
 0x171   : > { %v819_v19 = vpop.eup %818 }
 0x172   : > { %v383_v20 = vmul.f32 0.5, %v819_v19 }
 0x174   : > { %v384_v21 = vadd.f32 0.5, %v383_v20 }
 0x176   : > { %v385_v22 = vmul.f32 %v384_v21, %v378_v17 }
 0x178   : > { %688 = vmatmul.mubr.f32.vlgmr.msra.gmra.mrb[0].mxu1 %v385_v22 }
 0x24b   : > { %v475_v23 = vpop.f32.mrb[0].mxu1 }
 0x24c   : > { %v476_v24 = vadd.f32 %v597_v0, %v475_v23  ;;  %v689_v25 = vpop.f32.mrb[1].mxu1 }
 0x24e   : > { %479 = vst [vmem:[%s269_s7] sm:$0xff] %v476_v24 }
 0x24f   : > { %919 = shalt.err (!%p916_p2)
}
 0x250   : > { %s920_s12 = scalar_lea.hbm %s1221_s16, 128  ;;  %s924_s8 = scalar_lea.hbm %s1270_s5, 256 }
 0x251   : > { %p921_p13 = scmp.ne.s32.totalorder %s1221_s16, %s920_s12  ;;  %p925_p4 = scmp.lt.u32.totalorder %s1221_s16, %s1270_s5 }
 0x252   : > { %p926_p5 = scmp.lt.u32.totalorder %s924_s8, %s920_s12  ;;  %p928_p11 = scmp.lt.u32.totalorder %s920_s12, %s1221_s16 }
 0x253   : > { %p922_p6 = pnand %p921_p13, %p1284_p0 }
 0x254   : > { %p927_p8 = por %p926_p5, %p925_p4 }
 0x255   : > { %p923_p10 = pneg %p922_p6 }
 0x256   : > { %p929_p1 = por %p928_p11, %p927_p8 }
 0x258   : > { %p930_p3 = pnand %p929_p1, %p923_p10 }
 0x25a   : > { %933 = shalt.err (!%p930_p3)
}
 0x25b   : > { %756 = dma.vmem_to_hbm [thread:$0]  (%p1284_p0), %s1223_s6, 128, %s1221_s16, %s481_s9  }
 0x25c PF: > { %s506_s28 = sand.u32 1, %s964_s18   ;;  %p1285_p7 = scmp.ne.s32.totalorder %s1275_s25, 0 }
 0x25d   : > { %p1286_p9 = scmp.ge.s32.totalorder %s976_s21, 2  ;;  %s507_s7 = scalar_lea.sflag [#allocation4], %s506_s28 }
 0x25f   : > { %p770_p12 = pnand %p1286_p9, %p1285_p7 }
 0x261   : > { %959 = dma.done.wait (!%p770_p12), %s507_s7, 128  }
 0x262   : > { %961 = vsyncadd (!%p770_p12), %s507_s7, 4294967168  ;;  %p19_p2 = scmp.ge.s32.totalorder %s1127_s14, 4   ;;  %s1287_s18 = smov %s968_s19 }
 0x263   : > { %s1288_s19 = smov %s972_s20  ;;  %s1289_s20 = smov %s1143_s27 }
 0x264   : > { %s1290_s21 = smov %s1127_s14  ;;  %21 = sbr.rel (!%p19_p2) target bundleno = 6 (0x6), region = 93 }
 0x26b   :  { %512 = vsyncpa [#allocation3], 1 }
 0x26c   :  { %514 = vsyncpa [#allocation3 + $0x1], 1 }
 0x26d   :  { %515 = vsyncpa [#allocation6], 1 }
 0x26e   :  { %516 = vsyncpa [#allocation4], 1 }
 0x26f   :  { %518 = vsyncpa [#allocation4 + $0x1], 1 }

</bundles_post_ra>
